<compile_context>
chip_gen: v6e
topology: v6e:2x2x1
jax: 0.10.0
libtpu: 0.0.40
codegen_flags: <defaults>
</compile_context>

<pallas_src>
import math
import jax
import jax.numpy as jnp
from jax.experimental import pallas as pl
from jax.experimental.pallas import tpu as pltpu


# ----------------------------------------------------------------------------
# Conv branch: stride-2 3x3 conv (padding 1) as im2col + one Pallas GEMM
# ----------------------------------------------------------------------------

def _conv_gemm_kernel(w_ref, col_ref, b_ref, o_ref):
    # w_ref: (Cout, K) bf16, col_ref: (K, tn) bf16, b_ref: (Cout, 1) f32, o_ref: (Cout, tn) f32
    acc = jnp.dot(w_ref[...], col_ref[...], preferred_element_type=jnp.float32)
    o_ref[...] = acc + b_ref[...]


def _pick_tn(n):
    # n is a multiple of 128.  Prefer >= 2 lane-dense tiles (two v7x TensorCores) while
    # never splitting Cout (keeps MXU rows full).
    for cand in (512, 256, 128):
        if n % cand == 0 and n // cand >= 2:
            return cand
    for cand in (512, 256, 128):
        if n % cand == 0:
            return cand
    return n


def _gemm_vmem_bytes(cout, k, tn):
    # Double-buffered pipeline estimate: bf16 LHS/RHS, f32 bias + output.
    return 2 * (cout * k * 2 + k * tn * 2 + cout * 4 + cout * tn * 4)


def conv_gemm(w2d, col, bias):
    """(Cout,K)bf16 @ (K,N)bf16 + bias -> (Cout,N) f32.  N must be a multiple of 128."""
    Cout, K = w2d.shape
    K2, N = col.shape
    assert K == K2 and N % 128 == 0

    tn = _pick_tn(N)
    cap = 44 * 1024 * 1024                       # leave headroom under v7x's 64 MiB VMEM
    while _gemm_vmem_bytes(Cout, K, tn) > cap and tn > 128:
        tn //= 2
    # TODO(synk): for very large channel counts where even tn=128 full-K tiles exceed the
    # budget, add a K grid axis ("arbitrary", last) with a VMEM f32 accumulator.
    n_tiles = N // tn
    est = _gemm_vmem_bytes(Cout, K, tn)
    vmem_limit = int(min(48 * 1024 * 1024, max(32 * 1024 * 1024, est * 5 // 4)))

    return pl.pallas_call(
        _conv_gemm_kernel,
        out_shape=jax.ShapeDtypeStruct((Cout, N), jnp.float32),
        grid=(n_tiles,),
        in_specs=[pl.BlockSpec((Cout, K), lambda n: (0, 0)),   # resident weights
                  pl.BlockSpec((K, tn), lambda n: (0, n)),     # col streamed once
                  pl.BlockSpec((Cout, 1), lambda n: (0, 0))],  # resident bias
        out_specs=pl.BlockSpec((Cout, tn), lambda n: (0, n)),
        compiler_params=pltpu.CompilerParams(
            dimension_semantics=("parallel",),
            vmem_limit_bytes=vmem_limit),
    )(w2d, col, bias)


def _im2col_channel_major(x_cm, Hout, Wout):
    """x_cm: (C, B, H, W).  Returns (C*9, B*Hout*Wout) patches directly in GEMM layout."""
    C, B, H, W = x_cm.shape
    xp = jnp.pad(x_cm, ((0, 0), (0, 0), (1, 1), (1, 1)))
    # TODO(synk): fold patch extraction into the Pallas kernel itself (9 shifted matmuls
    # into a VMEM f32 accumulator) so this col intermediate never touches HBM.
    taps = [xp[:, :, ki:ki + 2 * Hout:2, kj:kj + 2 * Wout:2]   # each (C, B, Hout, Wout)
            for ki in range(3) for kj in range(3)]
    col = jnp.stack(taps, axis=1)                              # (C, 9, B, Hout, Wout)
    return col.reshape(C * 9, B * Hout * Wout)                 # no transpose needed


def downsample_conv(x, w, b):
    """Equivalent of nn.Conv2d(C, C, kernel_size=3, stride=2, padding=1) on NCHW input."""
    B, Cin, H, W = x.shape
    Cout = w.shape[0]
    Hout = (H - 1) // 2 + 1
    Wout = (W - 1) // 2 + 1

    # Cast to bf16 (MXU-native) and go channel-major in ONE fused pass.
    x_cm = x.transpose(1, 0, 2, 3).astype(jnp.bfloat16)        # (Cin, B, H, W)
    col = _im2col_channel_major(x_cm, Hout, Wout)              # (Cin*9, N) bf16

    n = B * Hout * Wout
    n_pad = ((n + 127) // 128) * 128                           # lane-dense GEMM output
    if n_pad != n:
        col = jnp.pad(col, ((0, 0), (0, n_pad - n)))

    w2d = w.reshape(Cout, Cin * 9).astype(jnp.bfloat16)
    bias = b.reshape(Cout, 1).astype(jnp.float32)

    out = conv_gemm(w2d, col, bias)                            # (Cout, n_pad) f32
    out = out[:, :n].reshape(Cout, B, Hout, Wout).transpose(1, 0, 2, 3)
    # Lane dims never move above; only leading dims are permuted back to NCHW.
    return out.astype(x.dtype)


# ----------------------------------------------------------------------------
# AvgPool branch: 2x2 / stride-2 average pool, reading x directly (no intermediates)
# ----------------------------------------------------------------------------

def _avgpool_kernel(x_ref, aw_ref, o_ref):
    # x_ref: (ct, He, We), aw_ref: (We, Wout) with aw[w, ow] = 0.25 iff w//2 == ow,
    # o_ref: (ct, Hout, Wout)
    ct, He, We = x_ref.shape
    hout = He // 2
    wout = aw_ref.shape[1]
    even = x_ref[:, pl.ds(0, hout, stride=2), :]       # sublane-strided loads: rows 0,2,...
    odd = x_ref[:, pl.ds(1, hout, stride=2), :]        # rows 1,3,...
    rows = even + odd                                   # (ct, Hout, We) VPU adds
    # Pool the lane (W) direction via a tiny 0.25-weighted matmul (stays on the
    # natively supported matmul path; MXU is otherwise idle in this mem-bound op).
    pooled = jnp.dot(rows.reshape(ct * hout, We), aw_ref[...],
                     preferred_element_type=jnp.float32)
    o_ref[...] = pooled.reshape(ct, hout, wout).astype(o_ref.dtype)


def _pick_pool_rows(m, h, w, itemsize, cap_bytes=2 * 1024 * 1024):
    divs = [d for d in range(1, m + 1) if m % d == 0]
    fits = [d for d in divs if d * h * w * itemsize <= cap_bytes] or [1]
    multi = [d for d in fits if m // d >= 2]            # >= 2 grid points for v7x megacore
    return max(multi) if multi else max(fits)


def downsample_avgpool(x):
    """Equivalent of AvgPool2d(kernel_size=2, stride=2) on NCHW input."""
    B, C, H, W = x.shape
    Hout, Wout = H // 2, W // 2
    He, We = 2 * Hout, 2 * Wout
    if (He, We) != (H, W):                              # PyTorch floors odd spatial dims
        x = x[:, :, :He, :We]

    m = B * C
    x2 = x.reshape(m, He, We)                           # free leading-dim merge
    aw = 0.25 * (jnp.arange(We)[:, None] // 2
                 == jnp.arange(Wout)[None, :]).astype(jnp.float32)   # (We, Wout)

    ct = _pick_pool_rows(m, He, We, jnp.dtype(x.dtype).itemsize)
    out = pl.pallas_call(
        _avgpool_kernel,
        out_shape=jax.ShapeDtypeStruct((m, Hout, Wout), x.dtype),
        grid=(m // ct,),
        in_specs=[pl.BlockSpec((ct, He, We), lambda i: (i, 0, 0)),
                  pl.BlockSpec((We, Wout), lambda i: (0, 0))],
        out_specs=pl.BlockSpec((ct, Hout, Wout), lambda i: (i, 0, 0)),
        compiler_params=pltpu.CompilerParams(
            dimension_semantics=("parallel",),
            vmem_limit_bytes=32 * 1024 * 1024),
    )(x2, aw)
    return out.reshape(B, C, Hout, Wout)


def downsample_forward(x, w, b, use_conv=True):
    return downsample_conv(x, w, b) if use_conv else downsample_avgpool(x)


# ----------------------------------------------------------------------------
# Main
# ----------------------------------------------------------------------------

if __name__ == "__main__":
    key = jax.random.PRNGKey(0)
    kx, kw, kb = jax.random.split(key, 3)

    B, C, H, W = 2, 32, 16, 16
    x = jax.random.normal(kx, (B, C, H, W), dtype=jnp.float32)
    fan_in = C * 3 * 3
    w = jax.random.normal(kw, (C, C, 3, 3), dtype=jnp.float32) / math.sqrt(fan_in)
    b = jax.random.normal(kb, (C,), dtype=jnp.float32) * 0.1

    conv_fn = jax.jit(downsample_conv)
    pool_fn = jax.jit(downsample_avgpool)

    y_conv = jax.block_until_ready(conv_fn(x, w, b))
    y_pool = jax.block_until_ready(pool_fn(x))

    assert y_conv.shape == (B, C, H // 2, W // 2), y_conv.shape
    assert y_pool.shape == (B, C, H // 2, W // 2), y_pool.shape
    assert bool(jnp.all(jnp.isfinite(y_conv)))
    assert bool(jnp.all(jnp.isfinite(y_pool)))

    # Correctness vs plain-JAX references (loose tol on conv: bf16 MXU inputs).
    ref_conv = jax.lax.conv_general_dilated(
        x, w, window_strides=(2, 2), padding=((1, 1), (1, 1)),
        dimension_numbers=('NCHW', 'OIHW', 'NCHW')) + b[None, :, None, None]
    ref_pool = 0.25 * (x[:, :, 0::2, 0::2] + x[:, :, 0::2, 1::2]
                       + x[:, :, 1::2, 0::2] + x[:, :, 1::2, 1::2])

    assert bool(jnp.allclose(y_conv, ref_conv, atol=1e-1, rtol=1e-1)), \
        float(jnp.max(jnp.abs(y_conv - ref_conv)))
    assert bool(jnp.allclose(y_pool, ref_pool, atol=1e-5, rtol=1e-5)), \
        float(jnp.max(jnp.abs(y_pool - ref_pool)))

    print("KERNEL_OK")
</pallas_src>

<mosaic_0001>
module attributes {stable_mosaic.version = 11 : i64} {
  func.func @_conv_gemm_kernel(%arg0: i32, %arg1: memref<32x288xbf16, #tpu.memory_space<vmem>>, %arg2: memref<288x128xbf16, #tpu.memory_space<vmem>>, %arg3: memref<32x1xf32, #tpu.memory_space<vmem>>, %arg4: memref<32x128xf32, #tpu.memory_space<vmem>>) attributes {dimension_semantics = [#tpu.dimension_semantics<parallel>], iteration_bounds = array<i64: 1>, scalar_prefetch = 0 : i64, scratch_operands = 0 : i64, tpu.core_type = #tpu.core_type<tc>, window_params = [{pipeline_mode = #tpu.pipeline_mode<synchronous>, transform_indices = @transform_0, window_bounds = array<i64: 32, 288>}, {transform_indices = @transform_1, window_bounds = array<i64: 288, 128>}, {pipeline_mode = #tpu.pipeline_mode<synchronous>, transform_indices = @transform_2, window_bounds = array<i64: 32, 1>}, {transform_indices = @transform_3, window_bounds = array<i64: 32, 128>}]} {
    %c0 = arith.constant 0 : index
    %c0_0 = arith.constant 0 : index
    %0 = vector.load %arg1[%c0, %c0_0] : memref<32x288xbf16, #tpu.memory_space<vmem>>, vector<32x288xbf16>
    %c0_1 = arith.constant 0 : index
    %c0_2 = arith.constant 0 : index
    %1 = vector.load %arg2[%c0_1, %c0_2] : memref<288x128xbf16, #tpu.memory_space<vmem>>, vector<288x128xbf16>
    %cst = arith.constant dense<0.000000e+00> : vector<32x128xf32>
    %2 = tpu.matmul %0, %1, %cst {dimension_numbers = #tpu.dot_dimension_numbers<[1], [0], [0], [1], [0, 0, 1, 1], [], []>} : vector<32x288xbf16>, vector<288x128xbf16>, vector<32x128xf32> -> vector<32x128xf32>
    %c0_3 = arith.constant 0 : index
    %c0_4 = arith.constant 0 : index
    %3 = vector.load %arg3[%c0_3, %c0_4] : memref<32x1xf32, #tpu.memory_space<vmem>>, vector<32x1xf32>
    %4 = vector.broadcast %3 : vector<32x1xf32> to vector<32x128xf32>
    %5 = arith.addf %2, %4 : vector<32x128xf32>
    %c0_5 = arith.constant 0 : index
    %c0_6 = arith.constant 0 : index
    %6 = vector.load %arg4[%c0_5, %c0_6] : memref<32x128xf32, #tpu.memory_space<vmem>>, vector<32x128xf32>
    tpu.vector_store %arg4[%c0_5, %c0_6], %5 {strides = array<i32>} : memref<32x128xf32, #tpu.memory_space<vmem>>, vector<32x128xf32>,
    return
  }
  func.func @transform_0(%arg0: i32) -> (i32, i32) {
    %c0_i32 = arith.constant 0 : i32
    %c0_i32_0 = arith.constant 0 : i32
    %c0_i32_1 = arith.constant 0 : i32
    return %c0_i32, %c0_i32_0 : i32, i32
  }
  func.func @transform_1(%arg0: i32) -> (i32, i32) {
    %c0_i32 = arith.constant 0 : i32
    %c0_i32_0 = arith.constant 0 : i32
    return %c0_i32, %arg0 : i32, i32
  }
  func.func @transform_2(%arg0: i32) -> (i32, i32) {
    %c0_i32 = arith.constant 0 : i32
    %c0_i32_0 = arith.constant 0 : i32
    %c0_i32_1 = arith.constant 0 : i32
    return %c0_i32, %c0_i32_0 : i32, i32
  }
  func.func @transform_3(%arg0: i32) -> (i32, i32) {
    %c0_i32 = arith.constant 0 : i32
    %c0_i32_0 = arith.constant 0 : i32
    return %c0_i32, %arg0 : i32, i32
  }
}

</mosaic_0001>

<bundles_post_ra>
// kernel: downsample_conv.1
= control target key start
LH: loop header
LB: loop body
LE: loop exit
PB: predicated region body
PF: predicated region fallthrough
CT: control target
= control target key end

     0   :  { %v429_v1 = vmov 0   ;;  %vm221_vm0 = vcmask 261120   ;;  %s548_s1 = inlined_call_operand.vmem [shape: bf16[288,128], index: 1, kind: input, shape index: {}]   ;;  %s549_s0 = inlined_call_operand.vmem [shape: bf16[32,288], index: 0, kind: input, shape index: {}]   ;;  %s550_s2 = inlined_call_operand.vmem [shape: f32[32,1], index: 2, kind: input, shape index: {}]   ;;  %s551_s3 = inlined_call_operand.vmem [shape: f32[32,128], index: 3, kind: output, shape index: {}]  }
   0x1   :  { %v403_v0 = vld [vmem:[%s548_s1 + $0x78] sm:$0xff]   ;;  %401 = vset.pattern.permute.xlu0 %v429_v1  ;;  %402 = vset.pattern.permute.xlu1 %v429_v1  ;;  %v405_v3 = vld [vmem:[%s548_s1 + $0x70] sm:$0xff]   ;;  %v407_v5 = vld [vmem:[%s548_s1 + $0x68] sm:$0xff]  }
   0x2   :  { %v404_v2 = vld [vmem:[%s548_s1 + $0x38] sm:$0xff]   ;;  %360 = vmatprep.subr.bf16.mxu0 %v403_v0  ;;  %v406_v4 = vld [vmem:[%s548_s1 + $0x30] sm:$0xff]   ;;  %v408_v6 = vld [vmem:[%s548_s1 + $0x28] sm:$0xff]  }
   0x3   :  { %361 = vmatpush3.bf16.msra.mxu0 %v404_v2  ;;  %v409_v7 = vld [vmem:[%s548_s1 + $0x60] sm:$0xff]   ;;  %v411_v9 = vld [vmem:[%s548_s1 + $0x58] sm:$0xff]   ;;  %v418_v11 = vld [vmem:[%s548_s1 + $0x88] sm:$0xff]  }
   0x4   :  { %362 = vmatprep.subr.bf16.mxu0 %v405_v3  ;;  %v410_v8 = vld [vmem:[%s548_s1 + $0x20] sm:$0xff]   ;;  %v412_v10 = vld [vmem:[%s548_s1 + $0x18] sm:$0xff]   ;;  %v413_v12 = vld [vmem:[%s548_s1 + $0x50] sm:$0xff]   ;;  %392 = vmatprep.subr.bf16.mxu1 %v418_v11 }
   0x5   :  { %v414_v13 = vld [vmem:[%s548_s1 + $0x10] sm:$0xff]   ;;  %v415_v14 = vld [vmem:[%s548_s1 + $0x48] sm:$0xff]   ;;  %393 = vmatpush3.bf16.msra.mxu1 %v418_v11  ;;  %v423_v16 = vld [vmem:[%s548_s1 + $0x80] sm:$0xff]  }
   0x6   :  { %v422_v15 = vld [vmem:[%s549_s0 + $0x4] ss:$12 sps:$4 sm:$0xff]   ;;  %v424_v17 = vld [vmem:[%s549_s0 + $0x8] ss:$12 sps:$4 sm:$0xff]   ;;  %394 = vmatprep.subr.bf16.mxu1 %v423_v16  ;;  %v425_v18 = vld [vmem:[%s549_s0 + $0x20] ss:$12 sps:$4 sm:$0xff]  }
   0x7   :  { %363 = vmatpush3.bf16.msra.mxu0 %v406_v4  ;;  %260 = vmatprep.mubr.bf16.mxu0 %v422_v15  ;;  %v59_v19 = vld [vmem:[%s550_s2] sm:$0xff]  ;;  %v416_v20 = vld [vmem:[%s548_s1 + $0x8] sm:$0xff]   ;;  %v61_v21 = vld [vmem:[%s550_s2 + $0x10] sm:$0xff] }
   0x8   :  { %364 = vmatprep.subr.bf16.mxu0 %v407_v5  ;;  %396 = vmatprep.mubr.msk.bf16.mxu1 %vm221_vm0, %v424_v17  ;;  %v417_v22 = vld [vmem:[%s548_s1 + $0x40] sm:$0xff]   ;;  %v60_v23 = vld [vmem:[%s550_s2 + $0x8] sm:$0xff]  ;;  %v62_v24 = vld [vmem:[%s550_s2 + $0x18] sm:$0xff] }
   0x9   :  { %395 = vmatpush3.bf16.msra.mxu1 %v423_v16  ;;  %65 = vperm.xlu0 %401, %v59_v19   ;;  %v419_v25 = vld [vmem:[%s548_s1] sm:$0xff]   ;;  %v426_v27 = vld [vmem:[%s549_s0 + $0x1c] ss:$12 sps:$4 sm:$0xff]  }
   0xa   :  { %75 = vperm.xlu1 %402, %v61_v21   ;;  %v420_v26 = vld [vmem:[%s549_s0] ss:$12 sps:$4 sm:$0xff]   ;;  %v428_v28 = vld [vmem:[%s549_s0 + $0x18] ss:$12 sps:$4 sm:$0xff]  }
   0xb   :  { %365 = vmatpush3.bf16.msra.mxu0 %v408_v6 }
   0xc   :  { %366 = vmatprep.subr.bf16.mxu0 %v409_v7  ;;  %397 = vmatmul.mubr.msk.bf16.vlgmr.msra.gmra.mxu1 %vm221_vm0, %v425_v18 }
   0xd   :  { %70 = vperm.xlu0 %401, %v60_v23  }
   0xe   :  { %80 = vperm.xlu1 %402, %v62_v24  }
   0xf   :  { %367 = vmatpush3.bf16.msra.mxu0 %v410_v8 }
  0x10   :  { %368 = vmatprep.subr.bf16.mxu0 %v411_v9 }
  0x13   :  { %369 = vmatpush3.bf16.msra.mxu0 %v412_v10 }
  0x14   :  { %370 = vmatprep.subr.bf16.mxu0 %v413_v12 }
  0x17   :  { %371 = vmatpush3.bf16.msra.mxu0 %v414_v13 }
  0x18   :  { %372 = vmatprep.subr.bf16.mxu0 %v415_v14 }
  0x1b   :  { %373 = vmatpush3.bf16.msra.mxu0 %v416_v20 }
  0x1c   :  { %374 = vmatprep.subr.bf16.mxu0 %v417_v22 }
  0x1f   :  { %375 = vmatpush3.bf16.msra.mxu0 %v419_v25 }
  0x22   :  { %261 = vmatmul.mubr.bf16.vlgmr.msra.gmra.mxu0 %v420_v26 }
  0x23   :  { %268 = vmatprep.mubr.bf16.mxu0 %v426_v27 }
  0x2a   :  { %269 = vmatmul.mubr.bf16.gmra.mxu0 %v428_v28 }
  0x84   :  { %v66_v30 = vpop.permute.xlu0 %65 }
  0x85   :  { %v76_v45 = vpop.permute.xlu1 %75 }
  0x88   :  { %v71_v39 = vpop.permute.xlu0 %70 }
  0x89   :  { %v81_v54 = vpop.permute.xlu1 %80 }
  0xcc   :  { %v398_v29 = vpop.f32.mrf.mxu1 }
  0xce   :  { %v311_v32 = vpop.f32.mrf.mxu1 }
  0xd0   :  { %v399_v36 = vpop.f32.mrf.mxu1 }
  0xd2   :  { %v314_v43 = vpop.f32.mrf.mxu1 }
  0xe2   :  { %v376_v31 = vpop.f32.mrf.mxu0 }
  0xe4   :  { %v377_v33 = vpop.f32.mrf.mxu0 }
  0xe5   :  { %v378_v34 = vadd.f32 %v377_v33, %v376_v31 }
  0xe6   :  { %v379_v35 = vpop.f32.mrf.mxu0 }
  0xe7   :  { %v263_v37 = vadd.f32 %v378_v34, %v66_v30 }
  0xe8   :  { %v380_v38 = vpop.f32.mrf.mxu0 }
  0xe9   :  { %v381_v40 = vadd.f32 %v380_v38, %v379_v35  ;;  %v312_v41 = vadd.f32 %v311_v32, %v263_v37 }
  0xea   :  { %v382_v42 = vpop.f32.mrf.mxu0 }
  0xeb   :  { %326 = vst [vmem:[%s551_s3] sm:$0xff] %v312_v41  ;;  %v266_v44 = vadd.f32 %v381_v40, %v71_v39 }
  0xec   :  { %v383_v46 = vpop.f32.mrf.mxu0 }
  0xed   :  { %v384_v47 = vadd.f32 %v383_v46, %v382_v42  ;;  %v315_v48 = vadd.f32 %v314_v43, %v266_v44 }
  0xee   :  { %v385_v49 = vpop.f32.mrf.mxu0 }
  0xef   :  { %v271_v50 = vadd.f32 %v384_v47, %v76_v45  ;;  %327 = vst [vmem:[%s551_s3 + $0x8] sm:$0xff] %v315_v48 }
  0xf0   :  { %v386_v51 = vpop.f32.mrf.mxu0 }
  0xf1   :  { %v320_v52 = vadd.f32 %v398_v29, %v271_v50  ;;  %v387_v53 = vadd.f32 %v386_v51, %v385_v49 }
  0xf3   :  { %328 = vst [vmem:[%s551_s3 + $0x10] sm:$0xff] %v320_v52  ;;  %v274_v55 = vadd.f32 %v387_v53, %v81_v54 }
  0xf5   :  { %v323_v56 = vadd.f32 %v399_v36, %v274_v55 }
  0xf7   :  { %329 = vst [vmem:[%s551_s3 + $0x18] sm:$0xff] %v323_v56 }

</bundles_post_ra>
